<compile_context>
chip_gen: v5e
topology: v5e:2x2
jax: 0.10.0
libtpu: 0.0.40
codegen_flags: <defaults>
</compile_context>

<pallas_src>
import functools

import jax
import jax.numpy as jnp
from jax import lax
from jax.experimental import pallas as pl
from jax.experimental.pallas import tpu as pltpu


def _round_up(x, m):
    return (x + m - 1) // m * m


def _pick_images_per_step(n, per_image_bytes, budget=2 << 20):
    """Largest divisor of n whose block stays under budget, preferring >=2 steps."""
    fits = [d for d in range(1, n + 1)
            if n % d == 0 and d * per_image_bytes <= budget]
    if not fits:
        return 1
    pipelined = [d for d in fits if n // d >= 2]
    return max(pipelined) if pipelined else max(fits)


def _conv_div_lrelu_kernel(x_ref, w_ref, o_ref, stk_ref, *, kh, kw, in_w,
                           cin_pad, q_pad, negative_slope):
    """One grid step processes `nb` images.

    x_ref  : [Nb, Cin, H*W]            flat NCHW spatial, one HBM read per image
    w_ref  : [Cout, 8 + KK*Cin_pad]    1/divisor folded; column 0 carries bias
    o_ref  : [Nb, Cout, Q_pad]         flat conv output (stride-W rows), lane-dense
    stk_ref: [8 + KK*Cin_pad, Q_pad]   VMEM scratch: stacked shifted input slices
    """
    nb, cin, hw = x_ref.shape
    w_full = w_ref[...]

    # Re-zero the stacked operand every step (cheap VMEM stores; keeps the
    # channel-padding rows zero and stays correct on every core under megacore
    # partitioning), then write the all-ones row that carries the bias through
    # the matmul contraction.
    stk_ref[...] = jnp.zeros_like(stk_ref)
    stk_ref[0:1, :] = jnp.ones((1, q_pad), stk_ref.dtype)

    for b in range(nb):                               # static, small
        x2d = x_ref[b]                                # [Cin, H*W]
        for i in range(kh):                           # static unrolled taps
            for j in range(kw):
                t = i * kw + j
                off = i * in_w + j                    # static flat shift
                row0 = 8 + t * cin_pad                # 8-aligned sublane slot
                valid = min(q_pad, hw - off)          # always >= #valid outputs
                stk_ref[row0:row0 + cin, 0:valid] = x2d[:, off:off + valid]

        # Single MXU dot: contraction K = 8 + KH*KW*Cin_pad (bias folded in).
        acc = jnp.dot(w_full, stk_ref[...], preferred_element_type=jnp.float32)
        o_ref[b] = jnp.where(acc > 0, acc, acc * negative_slope).astype(o_ref.dtype)


def conv_div_leaky_relu(x, weight, bias, divisor, negative_slope=0.01):
    """x: [N, Cin, H, W]; weight: [Cout, Cin, KH, KW]; bias: [Cout] -> NCHW out."""
    n, cin, h, w = x.shape
    cout, cin_w, kh, kw = weight.shape
    assert cin == cin_w and h >= kh and w >= kw
    oh, ow = h - kh + 1, w - kw + 1
    hw = h * w
    q_pad = _round_up(oh * w, 128)          # lane-dense flat output width
    kk = kh * kw
    cin_pad = _round_up(cin, 8)             # 8-aligned sublane slot per tap
    kfull = 8 + kk * cin_pad                # contraction size (slot 0 = bias)

    inv = jnp.float32(1.0 / float(divisor))
    # Fold 1/divisor into weights+bias; lay weights out as one 2-D MXU tile.
    w_taps = (weight.astype(jnp.float32) * inv).transpose(0, 2, 3, 1)   # [Cout,KH,KW,Cin]
    w_taps = w_taps.reshape(cout, kk, cin)
    w_taps = jnp.pad(w_taps, ((0, 0), (0, 0), (0, cin_pad - cin)))
    w_taps = w_taps.reshape(cout, kk * cin_pad)
    b_blk = jnp.pad((bias.astype(jnp.float32) * inv).reshape(cout, 1),
                    ((0, 0), (0, 7)))
    w_full = jnp.concatenate([b_blk, w_taps], axis=1)                   # [Cout, kfull]

    x_flat = x.reshape(n, cin, hw)          # free reshape, stays NCHW-contiguous

    per_image_bytes = 4 * (cin * hw + cout * q_pad)
    nb = _pick_images_per_step(n, per_image_bytes)
    grid = (n // nb,)

    kernel = functools.partial(
        _conv_div_lrelu_kernel, kh=kh, kw=kw, in_w=w, cin_pad=cin_pad,
        q_pad=q_pad, negative_slope=float(negative_slope))

    flops = int(2 * n * q_pad * kfull * cout)
    bytes_accessed = int(4 * (x_flat.size + w_full.size + n * cout * q_pad))

    out_flat = pl.pallas_call(
        kernel,
        out_shape=jax.ShapeDtypeStruct((n, cout, q_pad), jnp.float32),
        grid_spec=pltpu.PrefetchScalarGridSpec(
            num_scalar_prefetch=0,
            grid=grid,
            in_specs=[
                pl.BlockSpec((nb, cin, hw), lambda g: (g, 0, 0)),
                pl.BlockSpec((cout, kfull), lambda g: (0, 0)),
            ],
            out_specs=pl.BlockSpec((nb, cout, q_pad), lambda g: (g, 0, 0)),
            scratch_shapes=[pltpu.VMEM((kfull, q_pad), jnp.float32)],
        ),
        compiler_params=pltpu.CompilerParams(
            dimension_semantics=("parallel",)),
        cost_estimate=pl.CostEstimate(
            flops=flops, transcendentals=0, bytes_accessed=bytes_accessed),
    )(x_flat, w_full)

    # Output is already channel-major; one fused slice+reshape+slice epilogue.
    out = out_flat[:, :, :oh * w].reshape(n, cout, oh, w)[:, :, :, :ow]
    return out


def init_conv_params(key, in_channels, out_channels, kernel_size):
    """Deterministic init mimicking nn.Conv2d default (uniform +/- 1/sqrt(fan_in))."""
    kw_key, kb_key = jax.random.split(key)
    fan_in = in_channels * kernel_size * kernel_size
    bound = 1.0 / (fan_in ** 0.5)
    weight = jax.random.uniform(
        kw_key, (out_channels, in_channels, kernel_size, kernel_size),
        minval=-bound, maxval=bound, dtype=jnp.float32)
    bias = jax.random.uniform(
        kb_key, (out_channels,), minval=-bound, maxval=bound, dtype=jnp.float32)
    return weight, bias


if __name__ == "__main__":
    batch, in_channels, out_channels = 2, 4, 8
    height = width = 16
    kernel_size = 3
    divisor = 2.0

    key = jax.random.PRNGKey(0)
    xk, pk = jax.random.split(key)
    x = jax.random.normal(xk, (batch, in_channels, height, width),
                          dtype=jnp.float32)
    weight, bias = init_conv_params(pk, in_channels, out_channels, kernel_size)

    out = conv_div_leaky_relu(x, weight, bias, divisor)
    out = jax.block_until_ready(out)

    # Reference check (glue-level sanity, not part of the kernel).
    ref = lax.conv_general_dilated(
        x, weight, window_strides=(1, 1), padding="VALID",
        dimension_numbers=("NCHW", "OIHW", "NCHW"),
        precision=lax.Precision.HIGHEST)
    ref = (ref + bias.reshape(1, out_channels, 1, 1)) / divisor
    ref = jnp.where(ref > 0, ref, ref * 0.01)

    assert out.shape == (batch, out_channels, height - kernel_size + 1,
                         width - kernel_size + 1)
    max_err = float(jnp.max(jnp.abs(out - ref)))
    assert max_err < 1e-3, f"max abs err {max_err}"
    print("KERNEL_OK")
</pallas_src>

<mosaic_0001>
module attributes {stable_mosaic.version = 11 : i64} {
  func.func @_conv_div_lrelu_kernel(%arg0: i32, %arg1: memref<1x4x256xf32, #tpu.memory_space<vmem>>, %arg2: memref<8x80xf32, #tpu.memory_space<vmem>>, %arg3: memref<1x8x256xf32, #tpu.memory_space<vmem>>, %arg4: memref<80x256xf32, #tpu.memory_space<vmem>>) attributes {dimension_semantics = [#tpu.dimension_semantics<parallel>], iteration_bounds = array<i64: 2>, scalar_prefetch = 0 : i64, scratch_operands = 1 : i64, tpu.core_type = #tpu.core_type<tc>, window_params = [{transform_indices = @transform_0, window_bounds = array<i64: 1, 4, 256>}, {pipeline_mode = #tpu.pipeline_mode<synchronous>, transform_indices = @transform_1, window_bounds = array<i64: 8, 80>}, {transform_indices = @transform_2, window_bounds = array<i64: 1, 8, 256>}]} {
    %c0 = arith.constant 0 : index
    %c0_0 = arith.constant 0 : index
    %0 = vector.load %arg2[%c0, %c0_0] : memref<8x80xf32, #tpu.memory_space<vmem>>, vector<8x80xf32>
    %cst = arith.constant 0.000000e+00 : f32
    %1 = vector.broadcast %cst : f32 to vector<80x256xf32>
    %c0_1 = arith.constant 0 : index
    %c0_2 = arith.constant 0 : index
    %2 = vector.load %arg4[%c0_1, %c0_2] : memref<80x256xf32, #tpu.memory_space<vmem>>, vector<80x256xf32>
    tpu.vector_store %arg4[%c0_1, %c0_2], %1 {strides = array<i32>} : memref<80x256xf32, #tpu.memory_space<vmem>>, vector<80x256xf32>,
    %cst_3 = arith.constant 1.000000e+00 : f32
    %3 = vector.broadcast %cst_3 : f32 to vector<1x256xf32>
    %c0_4 = arith.constant 0 : index
    %c0_5 = arith.constant 0 : index
    %4 = vector.load %arg4[%c0_4, %c0_5] : memref<80x256xf32, #tpu.memory_space<vmem>>, vector<1x256xf32>
    tpu.vector_store %arg4[%c0_4, %c0_5], %3 {strides = array<i32>} : memref<80x256xf32, #tpu.memory_space<vmem>>, vector<1x256xf32>,
    %c0_6 = arith.constant 0 : index
    %c0_7 = arith.constant 0 : index
    %c0_8 = arith.constant 0 : index
    %5 = vector.load %arg1[%c0_6, %c0_7, %c0_8] : memref<1x4x256xf32, #tpu.memory_space<vmem>>, vector<1x4x256xf32>
    %6 = vector.shape_cast %5 : vector<1x4x256xf32> to vector<4x256xf32>
    %c8 = arith.constant 8 : index
    %c0_9 = arith.constant 0 : index
    %7 = vector.load %arg4[%c8, %c0_9] : memref<80x256xf32, #tpu.memory_space<vmem>>, vector<4x256xf32>
    tpu.vector_store %arg4[%c8, %c0_9], %6 {strides = array<i32>} : memref<80x256xf32, #tpu.memory_space<vmem>>, vector<4x256xf32>,
    %8 = vector.extract_strided_slice %6 {offsets = [0, 1], sizes = [4, 255], strides = [1, 1]} : vector<4x256xf32> to vector<4x255xf32>
    %c16 = arith.constant 16 : index
    %c0_10 = arith.constant 0 : index
    %9 = vector.load %arg4[%c16, %c0_10] : memref<80x256xf32, #tpu.memory_space<vmem>>, vector<4x255xf32>
    tpu.vector_store %arg4[%c16, %c0_10], %8 {strides = array<i32>} : memref<80x256xf32, #tpu.memory_space<vmem>>, vector<4x255xf32>,
    %10 = vector.extract_strided_slice %6 {offsets = [0, 2], sizes = [4, 254], strides = [1, 1]} : vector<4x256xf32> to vector<4x254xf32>
    %c24 = arith.constant 24 : index
    %c0_11 = arith.constant 0 : index
    %11 = vector.load %arg4[%c24, %c0_11] : memref<80x256xf32, #tpu.memory_space<vmem>>, vector<4x254xf32>
    tpu.vector_store %arg4[%c24, %c0_11], %10 {strides = array<i32>} : memref<80x256xf32, #tpu.memory_space<vmem>>, vector<4x254xf32>,
    %12 = vector.extract_strided_slice %6 {offsets = [0, 16], sizes = [4, 240], strides = [1, 1]} : vector<4x256xf32> to vector<4x240xf32>
    %c32 = arith.constant 32 : index
    %c0_12 = arith.constant 0 : index
    %13 = vector.load %arg4[%c32, %c0_12] : memref<80x256xf32, #tpu.memory_space<vmem>>, vector<4x240xf32>
    tpu.vector_store %arg4[%c32, %c0_12], %12 {strides = array<i32>} : memref<80x256xf32, #tpu.memory_space<vmem>>, vector<4x240xf32>,
    %14 = vector.extract_strided_slice %6 {offsets = [0, 17], sizes = [4, 239], strides = [1, 1]} : vector<4x256xf32> to vector<4x239xf32>
    %c40 = arith.constant 40 : index
    %c0_13 = arith.constant 0 : index
    %15 = vector.load %arg4[%c40, %c0_13] : memref<80x256xf32, #tpu.memory_space<vmem>>, vector<4x239xf32>
    tpu.vector_store %arg4[%c40, %c0_13], %14 {strides = array<i32>} : memref<80x256xf32, #tpu.memory_space<vmem>>, vector<4x239xf32>,
    %16 = vector.extract_strided_slice %6 {offsets = [0, 18], sizes = [4, 238], strides = [1, 1]} : vector<4x256xf32> to vector<4x238xf32>
    %c48 = arith.constant 48 : index
    %c0_14 = arith.constant 0 : index
    %17 = vector.load %arg4[%c48, %c0_14] : memref<80x256xf32, #tpu.memory_space<vmem>>, vector<4x238xf32>
    tpu.vector_store %arg4[%c48, %c0_14], %16 {strides = array<i32>} : memref<80x256xf32, #tpu.memory_space<vmem>>, vector<4x238xf32>,
    %18 = vector.extract_strided_slice %6 {offsets = [0, 32], sizes = [4, 224], strides = [1, 1]} : vector<4x256xf32> to vector<4x224xf32>
    %c56 = arith.constant 56 : index
    %c0_15 = arith.constant 0 : index
    %19 = vector.load %arg4[%c56, %c0_15] : memref<80x256xf32, #tpu.memory_space<vmem>>, vector<4x224xf32>
    tpu.vector_store %arg4[%c56, %c0_15], %18 {strides = array<i32>} : memref<80x256xf32, #tpu.memory_space<vmem>>, vector<4x224xf32>,
    %20 = vector.extract_strided_slice %6 {offsets = [0, 33], sizes = [4, 223], strides = [1, 1]} : vector<4x256xf32> to vector<4x223xf32>
    %c64 = arith.constant 64 : index
    %c0_16 = arith.constant 0 : index
    %21 = vector.load %arg4[%c64, %c0_16] : memref<80x256xf32, #tpu.memory_space<vmem>>, vector<4x223xf32>
    tpu.vector_store %arg4[%c64, %c0_16], %20 {strides = array<i32>} : memref<80x256xf32, #tpu.memory_space<vmem>>, vector<4x223xf32>,
    %22 = vector.extract_strided_slice %6 {offsets = [0, 34], sizes = [4, 222], strides = [1, 1]} : vector<4x256xf32> to vector<4x222xf32>
    %c72 = arith.constant 72 : index
    %c0_17 = arith.constant 0 : index
    %23 = vector.load %arg4[%c72, %c0_17] : memref<80x256xf32, #tpu.memory_space<vmem>>, vector<4x222xf32>
    tpu.vector_store %arg4[%c72, %c0_17], %22 {strides = array<i32>} : memref<80x256xf32, #tpu.memory_space<vmem>>, vector<4x222xf32>,
    %c0_18 = arith.constant 0 : index
    %c0_19 = arith.constant 0 : index
    %24 = vector.load %arg4[%c0_18, %c0_19] : memref<80x256xf32, #tpu.memory_space<vmem>>, vector<80x256xf32>
    %cst_20 = arith.constant dense<0.000000e+00> : vector<8x256xf32>
    %25 = tpu.matmul %0, %24, %cst_20 {dimension_numbers = #tpu.dot_dimension_numbers<[1], [0], [0], [1], [0, 0, 1, 1], [], []>} : vector<8x80xf32>, vector<80x256xf32>, vector<8x256xf32> -> vector<8x256xf32>
    %cst_21 = arith.constant 0.000000e+00 : f32
    %26 = vector.broadcast %cst_21 : f32 to vector<8x256xf32>
    %27 = arith.cmpf ogt, %25, %26 : vector<8x256xf32>
    %cst_22 = arith.constant 0.00999999977 : f32
    %28 = vector.broadcast %cst_22 : f32 to vector<8x256xf32>
    %29 = arith.mulf %25, %28 : vector<8x256xf32>
    %30 = arith.select %27, %25, %29 : vector<8x256xi1>, vector<8x256xf32>
    %c0_23 = arith.constant 0 : index
    %c0_24 = arith.constant 0 : index
    %c0_25 = arith.constant 0 : index
    %31 = vector.load %arg3[%c0_23, %c0_24, %c0_25] : memref<1x8x256xf32, #tpu.memory_space<vmem>>, vector<1x8x256xf32>
    %32 = vector.shape_cast %31 : vector<1x8x256xf32> to vector<8x256xf32>
    %33 = vector.shape_cast %30 : vector<8x256xf32> to vector<1x8x256xf32>
    tpu.vector_store %arg3[%c0_23, %c0_24, %c0_25], %33 {strides = array<i32>} : memref<1x8x256xf32, #tpu.memory_space<vmem>>, vector<1x8x256xf32>,
    return
  }
  func.func @transform_0(%arg0: i32) -> (i32, i32, i32) {
    %c0_i32 = arith.constant 0 : i32
    %c0_i32_0 = arith.constant 0 : i32
    %c0_i32_1 = arith.constant 0 : i32
    return %arg0, %c0_i32, %c0_i32_0 : i32, i32, i32
  }
  func.func @transform_1(%arg0: i32) -> (i32, i32) {
    %c0_i32 = arith.constant 0 : i32
    %c0_i32_0 = arith.constant 0 : i32
    %c0_i32_1 = arith.constant 0 : i32
    return %c0_i32, %c0_i32_0 : i32, i32
  }
  func.func @transform_2(%arg0: i32) -> (i32, i32, i32) {
    %c0_i32 = arith.constant 0 : i32
    %c0_i32_0 = arith.constant 0 : i32
    %c0_i32_1 = arith.constant 0 : i32
    return %arg0, %c0_i32, %c0_i32_0 : i32, i32, i32
  }
}

</mosaic_0001>

<bundles_post_ra>
// kernel: tpu_custom_call.1
= control target key start
LH: loop header
LB: loop body
LE: loop exit
PB: predicated region body
PF: predicated region fallthrough
CT: control target
= control target key end

     0   :  { %7 = vsyncpa [#allocation4], 0  ;;  %s890_s0 = inlined_call_operand.hbm [shape: f32[2,4,256], index: 0, kind: input, shape index: {}]   ;;  %s891_s1 = inlined_call_operand.hbm [shape: f32[8,80], index: 1, kind: input, shape index: {}]   ;;  %s892_s2 = inlined_call_operand.hbm [shape: f32[2,8,256], index: 2, kind: output, shape index: {}]  }
   0x1   :  { %9 = vsyncpa [#allocation4 + $0x1], 0 }
   0x2   :  { %10 = vsyncpa [#allocation7], 0 }
   0x3   :  { %11 = vsyncpa [#allocation5], 0 }
   0x4   :  { %13 = vsyncpa [#allocation5 + $0x1], 0  ;;  %s739_s9 = smov 0   ;;  %s741_s10 = smov 0  }
   0x5   :  { %s743_s11 = smov 0   ;;  %s745_s12 = smov 0  }
   0x6 LB: > { %s760_s13 = sadd.s32 4294967295, %s711_s12   ;;  %s494_s14 = sadd.s32 4294967294, %s711_s12   ;;  %s711_s12 = sphi %s745_s12, %s902_s12   ;;  %s707_s11 = sphi %s743_s11, %s901_s11   ;;  %s703_s10 = sphi %s741_s10, %s900_s10   ;;  %s699_s9 = sphi %s739_s9, %s899_s9  }
   0x7   : > { %p39_p0 = scmp.ne.s32.totalorder %s703_s10, %s699_s9  ;;  %p40_p1 = scmp.eq.s32.totalorder %s760_s13, 0 }
   0x8   : > { %p84_p2 = scmp.eq.s32.totalorder %s760_s13, 1  ;;  %p90_p3 = scmp.eq.s32.totalorder %s494_s14, 1 }
   0x9   : > { %p769_p4 = por %p40_p1, %p39_p0  ;;  %p495_p5 = scmp.ge.s32.totalorder %s711_s12, 1 }
   0xa   : > { %p774_p6 = por %p90_p3, %p39_p0  ;;  %p97_p7 = scmp.lt.s32.totalorder %s711_s12, 3 }
   0xb   : > { %s109_s19 = sshll.u32 %s891_s1, 4  ;;  %s713_s21 = smov [#allocation6]   ;;  %s110_s19 = int_to_ptr.hbm [resolvable:$true] %s109_s19 }
   0xc   : > { %p782_p8 = pnand %p495_p5, %p97_p7  ;;  %s111_s22 = sshll.u32 %s713_s21, 4  ;;  %s112_s22 = int_to_ptr.vmem [resolvable:$true] %s111_s22 }
   0xd   : > { %s792_s23 = sadd.s32 1, %s711_s12   ;;  %s26_s24 = sadd.s32 1, %s707_s11 }
   0xe   : > { %p522_p10 = pneg %p782_p8  ;;  %s23_s25 = ssub.s32 %s711_s12, %s792_s23 }
   0xf   : > { %p24_p12 = scmp.eq.s32.totalorder %s23_s25, 0  ;;  %p33_p13 = scmp.ne.s32.totalorder %s707_s11, %s703_s10 }
  0x10   : > { %p523_p11 = pnand %p522_p10, %p40_p1  ;;  %p34_p0 = scmp.eq.s32.totalorder %s711_s12, 0 }
  0x11   : > { %s801_s26 = scalar_select %p24_p12, %s707_s11, %s26_s24  }
  0x12   : > { %525 = dma.hbm_to_vmem [thread:$0]  (!%p523_p11), %s110_s19, 128, %s112_s22, [#allocation7]  }
  0x13   : > { %p805_p3 = por %p84_p2, %p33_p13  ;;  %p535_p5 = scmp.lt.s32.totalorder %s711_s12, 2 }
  0x14   : > { %s122_s28 = sand.u32 1, %s707_s11   ;;  %s512_s29 = sshll.u32 %s711_s12, 3 }
  0x15   : > { %p35_p7 = por %p34_p0, %p33_p13  ;;  %s498_s30 = sshll.u32 %s122_s28, 3 }
  0x16   : > { %s131_s5 = scalar_lea.hbm %s890_s0, %s512_s29  ;;  %s126_s7 = scalar_lea.vmem [#allocation3], %s498_s30 }
  0x17   : > { %s133_s6 = sshll.u32 %s131_s5, 4  ;;  %s135_s8 = sshll.u32 %s126_s7, 4  ;;  %s134_s6 = int_to_ptr.hbm [resolvable:$true] %s133_s6  ;;  %s136_s8 = int_to_ptr.vmem [resolvable:$true] %s135_s8 }
  0x18   : > { %p815_p10 = pnand %p535_p5, %p35_p7  ;;  %s123_s17 = scalar_lea.sflag [#allocation4], %s122_s28 }
  0x19   : > { %s611_s18 = sshra.s32 %s134_s6, 4  ;;  %s618_s24 = scalar_lea.hbm %s890_s0, 16  ;;  %s612_s18 = int_to_ptr.hbm [resolvable:$true] %s611_s18 }
  0x1a   : > { %s613_s19 = scalar_lea.hbm %s612_s18, 8  ;;  %p615_p11 = pneg %p815_p10 }
  0x1b   : > { %p614_p2 = scmp.ne.s32.totalorder %s612_s18, %s613_s19  ;;  %p619_p0 = scmp.lt.s32.totalorder %s612_s18, %s890_s0 }
  0x1c   : > { %p620_p5 = scmp.lt.s32.totalorder %s618_s24, %s613_s19 }
  0x1d   : > { %p616_p12 = pnand %p615_p11, %p614_p2 }
  0x1e   : > { %p621_p7 = por %p620_p5, %p619_p0 }
  0x1f   : > { %p617_p13 = pneg %p616_p12 }
  0x21   : > { %p622_p9 = pnand %p621_p7, %p617_p13 }
  0x23   : > { %625 = shalt.err (!%p622_p9)
}
  0x24   : > { %529 = dma.hbm_to_vmem [thread:$0]  (!%p815_p10), %s134_s6, 128, %s136_s8, %s123_s17  }
  0x25   : > { %144 = sbr.rel (%p782_p8) target bundleno = 403 (0x193), region = 28  ;;  %s832_s28 = sand.u32 (!%p782_p8), 1, %s703_s10  }
  0x26   : > { %s502_s30 = sshll.u32 (!%p782_p8), %s832_s28, 3  ;;  %s147_s3 = scalar_lea.sflag (!%p782_p8), [#allocation4], %s832_s28 }
  0x27   : > { %s150_s4 = scalar_lea.vmem (!%p782_p8), [#allocation3], %s502_s30 }
  0x2a   : > { %686 = dma.done.wait (%p769_p4), %s147_s3, 128  }
  0x2b   : > { %688 = vsyncadd (%p769_p4), %s147_s3, 4294967168 }
  0x2c   : > { %690 = dma.done.wait (%p40_p1), [#allocation7], 128  }
  0x2d   : > { %692 = vsyncadd (%p40_p1), [#allocation7], 4294967168  ;;  %v204_v0 = vld [vmem:[%s150_s4] sm:$0xff]  ;;  %s714_s15 = smov 111   ;;  %s715_s20 = smov 110   ;;  %v718_v17 = vmov 0.0   ;;  %v198_v31 = vlaneseq }
  0x2e   : > { %206 = vst [vmem:[#allocation1] ss:$2 sm:$0xff] %v204_v0  ;;  %s716_s5 = smov 96   ;;  %s717_s6 = smov 95   ;;  %vm267_vm0 = vcmask 904192   ;;  %vm262_vm1 = vcmask 908288  }
  0x2f   : > { %189 = vst [vmem:[#allocation2 + $0x58] sm:$0xff] %v718_v17  ;;  %s719_s7 = smov 94   ;;  %s720_s8 = smov 112   ;;  %vm290_vm2 = vcmask 785408   ;;  %vm295_vm3 = vcmask 781312   ;;  %vm281_vm4 = vcmask 896000  }
  0x30   : > { %178 = vst [vmem:[#allocation2] sm:$0xff] %v718_v17  ;;  %s721_s14 = smov 127   ;;  %s722_s17 = smov 126   ;;  %vm276_vm5 = vcmask 900096   ;;  %vm253_vm6 = vcmask 912384   ;;  %vm200_vm7 = vcmp.lt.s32.totalorder %v198_v31, 256 }
  0x31   : > { %179 = vst [vmem:[#allocation2 + $0x8] sm:$0xff] %v718_v17  ;;  %v723_v32 = vmov 1.0   ;;  %vm304_vm8 = vcmask 777216   ;;  %vm309_vm9 = vcmask 773120   ;;  %vm318_vm10 = vcmask 769024   ;;  %s504_s18 = sshll.u32 %s832_s28, 4 }
  0x32   : > { %180 = vst [vmem:[#allocation2 + $0x10] sm:$0xff] %v718_v17  ;;  %vm323_vm11 = vcmask 764928   ;;  %vm248_vm12 = vcmask 916480   ;;  %vm239_vm13 = vcmask 1027072   ;;  %vm234_vm14 = vcmask 1031168   ;;  %s513_s19 = sshll.u32 %s760_s13, 4 }
  0x33   : > { %181 = vst [vmem:[#allocation2 + $0x18] sm:$0xff] %v718_v17  ;;  %vm220_vm15 = vcmask 1039360   ;;  %s409_s24 = scalar_lea.hbm %s892_s2, %s513_s19  ;;  %s176_s25 = scalar_lea.vmem [#allocation8], %s504_s18 }
  0x34   : > { %182 = vst [vmem:[#allocation2 + $0x20] sm:$0xff] %v718_v17  ;;  %s411_s29 = sshll.u32 %s176_s25, 4  ;;  %s413_s30 = sshll.u32 %s409_s24, 4  ;;  %s412_s29 = int_to_ptr.vmem [resolvable:$true] %s411_s29  ;;  %s414_s30 = int_to_ptr.hbm [resolvable:$true] %s413_s30 }
  0x35   : > { %v844_v1 = vld.sshfl [vmem:[#allocation1] sm:$0xff pattern:$0x75316420]  ;;  %v846_v2 = vld.sshfl [vmem:[#allocation1 + $0x8] sm:$0xff pattern:$0x75316420] }
  0x36   : > { %213 = vst [vmem:[#allocation1] ss:$2 sm:$0xff] %v204_v0  ;;  %s398_s13 = scalar_lea.sflag [#allocation5], %s832_s28  ;;  %s655_s3 = sshra.s32 %s414_s30, 4  ;;  %s656_s3 = int_to_ptr.hbm [resolvable:$true] %s655_s3 }
  0x37   : > { %183 = vst [vmem:[#allocation2 + $0x28] sm:$0xff] %v718_v17  ;;  %s657_s4 = scalar_lea.hbm %s656_s3, 16  ;;  %p662_p9 = scmp.lt.s32.totalorder %s656_s3, %s892_s2 }
  0x38   : > { %184 = vst [vmem:[#allocation2 + $0x30] sm:$0xff] %v718_v17  ;;  %p658_p1 = scmp.ne.s32.totalorder %s656_s3, %s657_s4 }
  0x39   : > { %185 = vst [vmem:[#allocation2 + $0x38] sm:$0xff] %v718_v17 }
  0x3a   : > { %186 = vst [vmem:[#allocation2 + $0x40] sm:$0xff] %v718_v17  ;;  %p659_p4 = pnand %p658_p1, %p805_p3 }
  0x3b   : > { %187 = vst [vmem:[#allocation2 + $0x48] sm:$0xff] %v718_v17 }
  0x3c   : > { %188 = vst [vmem:[#allocation2 + $0x50] sm:$0xff] %v718_v17  ;;  %p660_p8 = pneg %p659_p4 }
  0x3d   : > { %v214_v3 = vld.sshfl [vmem:[#allocation1] sm:$0xff pattern:$0x75316420]  ;;  %v848_v4 = vld.sshfl [vmem:[#allocation1 + $0x8] sm:$0xff pattern:$0x75316420] }
  0x3e   : > { %227 = vst [vmem:[#allocation1] ss:$2 sm:$0xff] %v204_v0 }
  0x3f   : > { %190 = vst [vmem:[#allocation2 + $0x60] sm:$0xff] %v718_v17 }
  0x40   : > { %191 = vst [vmem:[#allocation2 + $0x68] sm:$0xff] %v718_v17 }
  0x41   : > { %192 = vst [vmem:[#allocation2 + $0x70] sm:$0xff] %v718_v17 }
  0x42   : > { %193 = vst [vmem:[#allocation2 + $0x78] sm:$0xff] %v718_v17 }
  0x43   : > { %194 = vst [vmem:[#allocation2 + $0x80] sm:$0xff] %v718_v17 }
  0x44   : > { %195 = vst [vmem:[#allocation2 + $0x88] sm:$0xff] %v718_v17 }
  0x45   : > { %v850_v5 = vld.sshfl [vmem:[#allocation1] sm:$0xff pattern:$0x75316420]  ;;  %v229_v6 = vld.sshfl [vmem:[#allocation1 + $0x8] sm:$0xff pattern:$0x75316420] }
  0x46   : > { %241 = vst [vmem:[#allocation1] ss:$2 sm:$0xff] %v204_v0 }
  0x47   : > { %196 = vst [vmem:[#allocation2 + $0x90] sm:$0xff] %v718_v17 }
  0x48   : > { %197 = vst [vmem:[#allocation2 + $0x98] sm:$0xff] %v718_v17 }
  0x49   : > { %211 = vst [vmem:[#allocation2 + $0x10] sm:$0xf] %v844_v1 }
  0x4a   : > { %212 = vst [vmem:[#allocation2 + $0x18] sm:$0xf] %v846_v2  ;;  %v177_v2 = vld [vmem:[#allocation6] sm:$0xff] }
  0x4b   : > { %202 = vst.msk [vmem:[#allocation2] ss:$8 sm:$0x3] %vm200_vm7, %v723_v32 }
  0x4d   : > { %v242_v7 = vld.sshfl [vmem:[#allocation1] sm:$0xff pattern:$0x75316420]  ;;  %v243_v8 = vld.sshfl [vmem:[#allocation1 + $0x8] sm:$0xff pattern:$0x75316420] }
  0x4e   : > { %255 = vst [vmem:[#allocation1] ss:$2 sm:$0xff] %v204_v0 }
  0x50   : > { %v327_v63 = vld [vmem:[#allocation2 + $0x10] sm:$0xff] }
  0x51   : > { %v328_v61 = vld [vmem:[#allocation2 + $0x18] sm:$0xff] }
  0x52   : > { %v325_v1 = vld [vmem:[#allocation2] sm:$0xff] }
  0x55   : > { %v257_v9 = vld.sshfl [vmem:[#allocation1 + $0x8] sm:$0xff pattern:$0x75316420]  ;;  %v256_v10 = vld.sshfl [vmem:[#allocation1] sm:$0xff pattern:$0x75316420] }
  0x56   : > { %260 = vrot.lane.b32.xlu0 %v257_v9, %s714_s15  ;;  %269 = vst [vmem:[#allocation1] ss:$2 sm:$0xff] %v204_v0  ;;  %258 = vrot.lane.b32.xlu2 %v256_v10, %s714_s15 }
  0x5d   : > { %v271_v11 = vld.sshfl [vmem:[#allocation1 + $0x8] sm:$0xff pattern:$0x75316420]  ;;  %v270_v12 = vld.sshfl [vmem:[#allocation1] sm:$0xff pattern:$0x75316420] }
  0x5e   : > { %274 = vrot.lane.b32.xlu1 %v271_v11, %s715_s20  ;;  %272 = vrot.lane.b32.xlu0 %v270_v12, %s715_s20  ;;  %283 = vst [vmem:[#allocation1] ss:$2 sm:$0xff] %v204_v0 }
  0x65   : > { %v284_v13 = vld.sshfl [vmem:[#allocation1] sm:$0xff pattern:$0x75316420]  ;;  %v285_v14 = vld.sshfl [vmem:[#allocation1 + $0x8] sm:$0xff pattern:$0x75316420] }
  0x66   : > { %297 = vst [vmem:[#allocation1] ss:$2 sm:$0xff] %v204_v0  ;;  %286 = vrot.lane.b32.xlu2 %v284_v13, %s716_s5 }
  0x6d   : > { %v298_v15 = vld.sshfl [vmem:[#allocation1] sm:$0xff pattern:$0x75316420]  ;;  %v299_v16 = vld.sshfl [vmem:[#allocation1 + $0x8] sm:$0xff pattern:$0x75316420] }
  0x6e   : > { %300 = vrot.lane.b32.xlu1 %v298_v15, %s717_s6  ;;  %311 = vst [vmem:[#allocation1] ss:$2 sm:$0xff] %v204_v0  ;;  %288 = vrot.lane.b32.xlu2 %v285_v14, %s716_s5  ;;  %v326_v0 = vld [vmem:[#allocation2 + $0x8] sm:$0xff]  ;;  %s661_s5 = scalar_lea.hbm %s892_s2, 32 }
  0x6f   : > { %p663_p10 = scmp.lt.s32.totalorder %s661_s5, %s657_s4 }
  0x71   : > { %p664_p2 = por %p663_p10, %p662_p9 }
  0x73   : > { %p665_p11 = pnand %p664_p2, %p660_p8 }
  0x75   : > { %v312_v18 = vld.sshfl [vmem:[#allocation1] sm:$0xff pattern:$0x75316420]  ;;  %v313_v19 = vld.sshfl [vmem:[#allocation1 + $0x8] sm:$0xff pattern:$0x75316420] }
  0x76   : > { %302 = vrot.lane.b32.xlu1 %v299_v16, %s717_s6  ;;  %314 = vrot.lane.b32.xlu0 %v312_v18, %s719_s7 }
  0x77   : > { %246 = vrot.lane.b32.xlu2 %v243_v8, %s720_s8 }
  0x7e   : > { %244 = vrot.lane.b32.xlu1 %v242_v7, %s720_s8  ;;  %316 = vrot.lane.b32.xlu0 %v313_v19, %s719_s7 }
  0x7f   : > { %216 = vrot.lane.b32.xlu2 %v214_v3, %s721_s14 }
  0x86   : > { %232 = vrot.lane.b32.xlu1 %v229_v6, %s722_s17  ;;  %230 = vrot.lane.b32.xlu0 %v850_v5, %s722_s17 }
  0x8e   : > { %218 = vrot.lane.b32.xlu0 %v848_v4, %s721_s14 }
  0xb0   : > { %v259_v20 = vpop.permute.xlu2 %258 }
  0xc0   : > { %v287_v21 = vpop.permute.xlu2 %286 }
  0xc8   : > { %v261_v22 = vpop.permute.xlu0 %260  ;;  %v289_v23 = vpop.permute.xlu2 %288 }
  0xc9   : > { %268 = vst.msk [vmem:[#allocation2 + $0x58] sm:$0xf] %vm267_vm0, %v261_v22  ;;  %v263_v24 = vsel %vm262_vm1, %v259_v20, %v261_v22  ;;  %v291_v25 = vsel %vm290_vm2, %v287_v21, %v289_v23  ;;  %vm225_vm0 = vcmask 1035264   ;;  %vm345_vm1 = vcmask 654336  }
  0xca   : > { %266 = vst [vmem:[#allocation2 + $0x50] sm:$0xf] %v263_v24 }
  0xcb   : > { %294 = vst [vmem:[#allocation2 + $0x70] sm:$0xf] %v291_v25 }
  0xcc   : > { %296 = vst.msk [vmem:[#allocation2 + $0x78] sm:$0xf] %vm295_vm3, %v289_v23 }
  0xd0   : > { %v275_v26 = vpop.permute.xlu1 %274  ;;  %v273_v27 = vpop.permute.xlu0 %272  ;;  %v336_v53 = vld [vmem:[#allocation2 + $0x58] sm:$0xff] }
  0xd1   : > { %282 = vst.msk [vmem:[#allocation2 + $0x68] sm:$0xf] %vm281_vm4, %v275_v26  ;;  %v277_v28 = vsel %vm276_vm5, %v273_v27, %v275_v26  ;;  %v247_v29 = vpop.permute.xlu2 %246  ;;  %v335_v55 = vld [vmem:[#allocation2 + $0x50] sm:$0xff] }
  0xd2   : > { %280 = vst [vmem:[#allocation2 + $0x60] sm:$0xf] %v277_v28  ;;  %v339_v48 = vld [vmem:[#allocation2 + $0x70] sm:$0xff] }
  0xd3   : > { %254 = vst.msk [vmem:[#allocation2 + $0x48] sm:$0xf] %vm253_vm6, %v247_v29  ;;  %v340_v47 = vld [vmem:[#allocation2 + $0x78] sm:$0xff] }
  0xd8   : > { %v338_v49 = vld [vmem:[#allocation2 + $0x68] sm:$0xff] }
  0xd9   : > { %v217_v50 = vpop.permute.xlu2 %216  ;;  %v337_v51 = vld [vmem:[#allocation2 + $0x60] sm:$0xff] }
  0xda   : > { %v334_v56 = vld [vmem:[#allocation2 + $0x48] sm:$0xff] }
  0xe0   : > { %v301_v30 = vpop.permute.xlu1 %300 }
  0xe8   : > { %v303_v33 = vpop.permute.xlu1 %302  ;;  %v315_v34 = vpop.permute.xlu0 %314 }
  0xe9   : > { %v305_v35 = vsel %vm304_vm8, %v301_v30, %v303_v33  ;;  %310 = vst.msk [vmem:[#allocation2 + $0x88] sm:$0xf] %vm309_vm9, %v303_v33 }
  0xea   : > { %308 = vst [vmem:[#allocation2 + $0x80] sm:$0xf] %v305_v35 }
  0xf0   : > { %v245_v36 = vpop.permute.xlu1 %244  ;;  %v317_v37 = vpop.permute.xlu0 %316  ;;  %v342_v45 = vld [vmem:[#allocation2 + $0x88] sm:$0xff] }
  0xf1   : > { %v319_v38 = vsel %vm318_vm10, %v315_v34, %v317_v37  ;;  %324 = vst.msk [vmem:[#allocation2 + $0x98] sm:$0xf] %vm323_vm11, %v317_v37  ;;  %v249_v39 = vsel %vm248_vm12, %v245_v36, %v247_v29  ;;  %v341_v46 = vld [vmem:[#allocation2 + $0x80] sm:$0xff] }
  0xf2   : > { %322 = vst [vmem:[#allocation2 + $0x90] sm:$0xf] %v319_v38 }
  0xf3   : > { %252 = vst [vmem:[#allocation2 + $0x40] sm:$0xf] %v249_v39 }
  0xf8   : > { %v233_v40 = vpop.permute.xlu1 %232  ;;  %v231_v41 = vpop.permute.xlu0 %230  ;;  %v344_v42 = vld [vmem:[#allocation2 + $0x98] sm:$0xff] }
  0xf9   : > { %240 = vst.msk [vmem:[#allocation2 + $0x38] sm:$0xf] %vm239_vm13, %v233_v40  ;;  %v235_v43 = vsel %vm234_vm14, %v231_v41, %v233_v40  ;;  %375 = vmatpush.msra.mxu1 %v344_v42  ;;  %v343_v44 = vld [vmem:[#allocation2 + $0x90] sm:$0xff] }
  0xfa   : > { %238 = vst [vmem:[#allocation2 + $0x30] sm:$0xf] %v235_v43  ;;  %355 = vmatpush.msra.mxu0 %v343_v44  ;;  %v333_v58 = vld [vmem:[#allocation2 + $0x40] sm:$0xff] }
  0xfb   : > { %376 = vmatpush.msra.mxu1 %v342_v45 }
  0xfc   : > { %356 = vmatpush.msra.mxu0 %v341_v46 }
  0xfd   : > { %377 = vmatpush.msra.mxu1 %v340_v47 }
  0xfe   : > { %357 = vmatpush.msra.mxu0 %v339_v48 }
  0xff   : > { %378 = vmatpush.msra.mxu1 %v338_v49 }
 0x100   : > { %v219_v52 = vpop.permute.xlu0 %218  ;;  %358 = vmatpush.msra.mxu0 %v337_v51  ;;  %v332_v57 = vld [vmem:[#allocation2 + $0x38] sm:$0xff] }
 0x101   : > { %v221_v54 = vsel %vm220_vm15, %v217_v50, %v219_v52  ;;  %226 = vst.msk [vmem:[#allocation2 + $0x28] sm:$0xf] %vm225_vm0, %v219_v52  ;;  %379 = vmatpush.msra.mxu1 %v336_v53  ;;  %v331_v59 = vld [vmem:[#allocation2 + $0x30] sm:$0xff] }
 0x102   : > { %224 = vst [vmem:[#allocation2 + $0x20] sm:$0xf] %v221_v54  ;;  %359 = vmatpush.msra.mxu0 %v335_v55 }
 0x103   : > { %380 = vmatpush.msra.mxu1 %v334_v56 }
 0x104   : > { %360 = vmatpush.msra.mxu0 %v333_v58 }
 0x105   : > { %381 = vmatpush.msra.mxu1 %v332_v57 }
 0x106   : > { %361 = vmatpush.msra.mxu0 %v331_v59 }
 0x108   : > { %v330_v60 = vld [vmem:[#allocation2 + $0x28] sm:$0xff] }
 0x109   : > { %382 = vmatpush.msra.mxu1 %v330_v60  ;;  %v329_v62 = vld [vmem:[#allocation2 + $0x20] sm:$0xff] }
 0x10a   : > { %362 = vmatpush.msra.mxu0 %v329_v62 }
 0x10b   : > { %383 = vmatpush.msra.mxu1 %v328_v61 }
 0x10c   : > { %363 = vmatpush.msra.mxu0 %v327_v63 }
 0x10d   : > { %384 = vmatpush.msra.mxu1 %v326_v0 }
 0x10e   : > { %364 = vmatpush.msra.mxu0 %v325_v1  ;;  %506 = vmatmul.msk.f32.vlgmr.msra.gmra.mxu1 %vm345_vm1, %v177_v2 }
 0x10f   : > { %505 = vmatmul.msk.f32.vlgmr.msra.gmra.mxu0 %vm345_vm1, %v177_v2 }
 0x18b   : > { %v386_v3 = vpop.f32.mrf.mxu1 }
 0x18c   : > { %vm390_vm2 = vcmp.gt.f32.partialorder %v386_v3, 0.0  ;;  %v392_v4 = vmul.f32 0.01, %v386_v3  ;;  %v366_v5 = vpop.f32.mrf.mxu0 }
 0x18d   : > { %vm389_vm3 = vcmp.gt.f32.partialorder %v366_v5, 0.0  ;;  %v391_v6 = vmul.f32 0.01, %v366_v5 }
 0x18e   : > { %v394_v7 = vsel %vm390_vm2, %v386_v3, %v392_v4 }
 0x18f   : > { %396 = vst [vmem:[%s176_s25 + $0x8] sm:$0xff] %v394_v7  ;;  %v393_v8 = vsel %vm389_vm3, %v366_v5, %v391_v6 }
 0x190   : > { %395 = vst [vmem:[%s176_s25] sm:$0xff] %v393_v8 }
 0x191   : > { %668 = shalt.err (!%p665_p11)
}
 0x192   : > { %520 = dma.vmem_to_hbm [thread:$0]  (%p805_p3), %s412_s29, 256, %s414_s30, %s398_s13  }
 0x193 PF: > { %s425_s28 = sand.u32 1, %s699_s9   ;;  %p898_p12 = scmp.ge.s32.totalorder %s711_s12, 2 }
 0x194   : > { %s426_s8 = scalar_lea.sflag [#allocation5], %s425_s28 }
 0x195   : > { %p531_p13 = pnand %p898_p12, %p774_p6 }
 0x197   : > { %p532_p0 = pneg %p531_p13 }
 0x199   : > { %694 = dma.done.wait (%p532_p0), %s426_s8, 256  }
 0x19a   : > { %696 = vsyncadd (%p532_p0), %s426_s8, 4294967040  ;;  %p16_p5 = scmp.ge.s32.totalorder %s792_s23, 4   ;;  %s899_s9 = smov %s703_s10 }
 0x19b   : > { %s900_s10 = smov %s707_s11  ;;  %s901_s11 = smov %s801_s26 }
 0x19c   : > { %s902_s12 = smov %s792_s23  ;;  %18 = sbr.rel (!%p16_p5) target bundleno = 6 (0x6), region = 77 }
 0x1a1   :  { %432 = vsyncpa [#allocation4], 1 }
 0x1a2   :  { %434 = vsyncpa [#allocation4 + $0x1], 1 }
 0x1a3   :  { %435 = vsyncpa [#allocation7], 1 }
 0x1a4   :  { %436 = vsyncpa [#allocation5], 1 }
 0x1a5   :  { %438 = vsyncpa [#allocation5 + $0x1], 1 }

</bundles_post_ra>
